<compile_context>
chip_gen: v6e
topology: v6e:2x2x1
jax: 0.10.0
libtpu: 0.0.40
codegen_flags: <defaults>
</compile_context>

<pallas_src>
import functools

import jax
import jax.numpy as jnp
from jax import lax
from jax.experimental import pallas as pl
from jax.experimental.pallas import tpu as pltpu


def _round_up(x, m):
    return (x + m - 1) // m * m


def rnn_chunk_kernel(x_ref, h0_ref, w0t_ref, wt_ref, b_ref,
                     y_ref, h_scratch, *, num_layers, tt):
    """One grid step = TT recurrence steps.

    x_ref  : (TT, Bp, 1)   input chunk (time-major, batch padded, NOT layer-replicated)
    h0_ref : (L*Bp, Hp)    initial hidden (resident, used only on chunk 0)
    w0t_ref: (1, Hp)       fc0.weight^T (padded)
    wt_ref : (Hp, Hp)      fc.weight^T (padded)
    b_ref  : (1, Hp)       fc0.bias + fc.bias (padded)
    y_ref  : (TT, L*Bp, Hp) per-step hidden outputs for this chunk
    h_scratch: (L*Bp, Hp)  persistent f32 hidden state across chunks
    """
    c = pl.program_id(0)

    # Load initial hidden into the persistent VMEM scratch on the first chunk.
    @pl.when(c == 0)
    def _():
        h_scratch[...] = h0_ref[...]

    # Constant operands: read once per chunk, already f32 (no per-step casts).
    w0t = w0t_ref[...]          # (1, Hp)
    wt = wt_ref[...]            # (Hp, Hp)
    b = b_ref[...]              # (1, Hp)

    bbp, hp = h_scratch.shape
    bp = bbp // num_layers

    def step(i, carry):
        x_t = x_ref[i]                                  # (Bp, 1)
        # fc0: in_features == 1 -> exact broadcast multiply; shared across layers.
        fc0_out = x_t * w0t                             # (Bp, Hp)
        if num_layers > 1:
            fc0_out = jnp.broadcast_to(
                fc0_out[None], (num_layers, bp, hp)).reshape(bbp, hp)
        h = h_scratch[...]                              # (L*Bp, Hp)
        fc_out = jnp.dot(h, wt, preferred_element_type=jnp.float32)
        h_new = jnp.tanh(fc0_out + fc_out + b)
        h_scratch[...] = h_new
        y_ref[i] = h_new.astype(y_ref.dtype)
        return carry

    lax.fori_loop(0, tt, step, 0, unroll=True)


def vanilla_rnn_forward(x, hidden, w0, b0, w, b, *, time_chunk=None):
    """x: (B, T, 1) float32, hidden: (L, B, H) float32.
    Returns (y, h_final) with y: (B, T*L, H), h_final: (L, B, H)."""
    B, T, F = x.shape
    L, B2, H = hidden.shape
    assert B == B2 and F == 1

    # Pad to TPU tile granularity: 8 sublanes (f32) on batch, 128 lanes on hidden,
    # so every load/store is lane-dense and the matmul presents full MXU tiles.
    Bp = _round_up(B, 8)
    Hp = _round_up(H, 128)
    BBp = L * Bp

    # Time-major x with padded batch (no layer replication -> no L x HBM traffic).
    x_t = jnp.transpose(x, (1, 0, 2))                                # (T, B, 1)
    x_t = jnp.pad(x_t, ((0, 0), (0, Bp - B), (0, 0)))                # (T, Bp, 1)

    h0 = jnp.pad(hidden, ((0, 0), (0, Bp - B), (0, Hp - H))).reshape(BBp, Hp)
    w0t = jnp.pad(jnp.transpose(w0), ((0, 0), (0, Hp - H)))          # (1, Hp)
    wt = jnp.pad(jnp.transpose(w), ((0, Hp - H), (0, Hp - H)))       # (Hp, Hp)
    bsum = jnp.pad((b0 + b).reshape(1, H), ((0, 0), (0, Hp - H)))    # (1, Hp)

    # TT recurrence steps per grid invocation. For small T, collapse the whole
    # sequence into a single invocation (x, weights and the y chunk all resident).
    if time_chunk is None:
        time_chunk = T if T <= 64 else 16
    tt = min(time_chunk, T)
    while T % tt:           # pick a chunk size that divides T
        tt -= 1
    grid = (T // tt,)

    kernel = functools.partial(rnn_chunk_kernel, num_layers=L, tt=tt)

    y_seq = pl.pallas_call(
        kernel,
        out_shape=jax.ShapeDtypeStruct((T, BBp, Hp), x.dtype),
        grid_spec=pltpu.PrefetchScalarGridSpec(
            num_scalar_prefetch=0,
            grid=grid,
            in_specs=[
                pl.BlockSpec((tt, Bp, F), lambda c: (c, 0, 0)),   # x chunk
                pl.BlockSpec((BBp, Hp), lambda c: (0, 0)),        # initial hidden
                pl.BlockSpec((F, Hp), lambda c: (0, 0)),          # fc0 weight^T
                pl.BlockSpec((Hp, Hp), lambda c: (0, 0)),         # fc weight^T
                pl.BlockSpec((1, Hp), lambda c: (0, 0)),          # combined bias
            ],
            out_specs=pl.BlockSpec((tt, BBp, Hp), lambda c: (c, 0, 0)),
            scratch_shapes=[pltpu.VMEM((BBp, Hp), jnp.float32)],
        ),
        compiler_params=pltpu.CompilerParams(
            dimension_semantics=("arbitrary",),   # recurrence: sequential over time
        ),
    )(x_t, h0, w0t, wt, bsum)

    # Unpad + match torch.cat(y_list).permute(1, 0, 2):
    #   y[b, i*L + l, :] = hidden_i[l, b, :]
    y_full = y_seq.reshape(T, L, Bp, Hp)[:, :, :B, :H]                # (T, L, B, H)
    y = jnp.transpose(y_full, (2, 0, 1, 3)).reshape(B, T * L, H)
    # Final hidden is the last time step of y (no separate writeback DMA).
    h_final = y_full[T - 1]                                           # (L, B, H)
    return y, h_final


def reference_forward(x, hidden, w0, b0, w, b):
    """Pure-JAX mirror of the PyTorch forward, for verification."""
    B, T, F = x.shape
    ys = []
    h = hidden
    for i in range(T):
        inp = x[:, i, :]                                    # (B, 1)
        fc0_o = inp @ w0.T + b0                             # (B, H)
        fc_o = h @ w.T + b                                  # (L, B, H)
        h = jnp.tanh(fc0_o + fc_o)                          # (L, B, H)
        ys.append(h)
    y = jnp.concatenate(ys, axis=0).transpose(1, 0, 2)      # (B, T*L, H)
    return y, h


if __name__ == "__main__":
    B, T, H, L, F = 2, 8, 32, 1, 1   # input_size=1, num_layers=1, hidden_size=32, batch_first=True

    key = jax.random.PRNGKey(0)
    kx, kh, k1, k2, k3, k4 = jax.random.split(key, 6)

    # Deterministic parameter init (torch.nn.Linear-style uniform bounds).
    bound0 = 1.0  # 1/sqrt(in_features=1)
    w0 = jax.random.uniform(k1, (H, F), jnp.float32, -bound0, bound0)   # fc0.weight
    b0 = jax.random.uniform(k2, (H,), jnp.float32, -bound0, bound0)     # fc0.bias
    bound = 1.0 / (H ** 0.5)
    w = jax.random.uniform(k3, (H, H), jnp.float32, -bound, bound)      # fc.weight
    b = jax.random.uniform(k4, (H,), jnp.float32, -bound, bound)        # fc.bias

    x = jax.random.normal(kx, (B, T, F), jnp.float32)
    hidden0 = jax.random.normal(kh, (L, B, H), jnp.float32)

    y, h_final = jax.jit(vanilla_rnn_forward)(x, hidden0, w0, b0, w, b)
    jax.block_until_ready((y, h_final))

    y_ref, h_ref = reference_forward(x, hidden0, w0, b0, w, b)
    assert y.shape == (B, T * L, H) and h_final.shape == (L, B, H)
    assert jnp.allclose(y, y_ref, rtol=1e-5, atol=1e-5)
    assert jnp.allclose(h_final, h_ref, rtol=1e-5, atol=1e-5)

    print("KERNEL_OK")
</pallas_src>

<mosaic_0001>
module attributes {stable_mosaic.version = 11 : i64} {
  func.func @rnn_chunk_kernel(%arg0: i32, %arg1: memref<8x8x1xf32, #tpu.memory_space<vmem>>, %arg2: memref<8x128xf32, #tpu.memory_space<vmem>>, %arg3: memref<1x128xf32, #tpu.memory_space<vmem>>, %arg4: memref<128x128xf32, #tpu.memory_space<vmem>>, %arg5: memref<1x128xf32, #tpu.memory_space<vmem>>, %arg6: memref<8x8x128xf32, #tpu.memory_space<vmem>>, %arg7: memref<8x128xf32, #tpu.memory_space<vmem>>) attributes {dimension_semantics = [#tpu.dimension_semantics<arbitrary>], iteration_bounds = array<i64: 1>, scalar_prefetch = 0 : i64, scratch_operands = 1 : i64, tpu.core_type = #tpu.core_type<tc>, window_params = [{transform_indices = @transform_0, window_bounds = array<i64: 8, 8, 1>}, {pipeline_mode = #tpu.pipeline_mode<synchronous>, transform_indices = @transform_1, window_bounds = array<i64: 8, 128>}, {pipeline_mode = #tpu.pipeline_mode<synchronous>, transform_indices = @transform_2, window_bounds = array<i64: 1, 128>}, {pipeline_mode = #tpu.pipeline_mode<synchronous>, transform_indices = @transform_3, window_bounds = array<i64: 128, 128>}, {pipeline_mode = #tpu.pipeline_mode<synchronous>, transform_indices = @transform_4, window_bounds = array<i64: 1, 128>}, {transform_indices = @transform_5, window_bounds = array<i64: 8, 8, 128>}]} {
    %c0_i32 = arith.constant 0 : i32
    %0 = arith.cmpi eq, %arg0, %c0_i32 : i32
    %1 = arith.extui %0 : i1 to i32
    %c0_i32_0 = arith.constant 0 : i32
    %2 = arith.cmpi ne, %1, %c0_i32_0 : i32
    scf.if %2 {
      %c0_78 = arith.constant 0 : index
      %c0_79 = arith.constant 0 : index
      %142 = vector.load %arg2[%c0_78, %c0_79] : memref<8x128xf32, #tpu.memory_space<vmem>>, vector<8x128xf32>
      %c0_80 = arith.constant 0 : index
      %c0_81 = arith.constant 0 : index
      %143 = vector.load %arg7[%c0_80, %c0_81] : memref<8x128xf32, #tpu.memory_space<vmem>>, vector<8x128xf32>
      tpu.vector_store %arg7[%c0_80, %c0_81], %142 {strides = array<i32>} : memref<8x128xf32, #tpu.memory_space<vmem>>, vector<8x128xf32>,
    } else {
    }
    %c0 = arith.constant 0 : index
    %c0_1 = arith.constant 0 : index
    %3 = vector.load %arg3[%c0, %c0_1] : memref<1x128xf32, #tpu.memory_space<vmem>>, vector<1x128xf32>
    %c0_2 = arith.constant 0 : index
    %c0_3 = arith.constant 0 : index
    %4 = vector.load %arg4[%c0_2, %c0_3] : memref<128x128xf32, #tpu.memory_space<vmem>>, vector<128x128xf32>
    %c0_4 = arith.constant 0 : index
    %c0_5 = arith.constant 0 : index
    %5 = vector.load %arg5[%c0_4, %c0_5] : memref<1x128xf32, #tpu.memory_space<vmem>>, vector<1x128xf32>
    %c0_i32_6 = arith.constant 0 : i32
    %6 = arith.index_cast %c0_i32_6 : i32 to index
    %c0_7 = arith.constant 0 : index
    %c0_8 = arith.constant 0 : index
    %7 = vector.load %arg1[%6, %c0_7, %c0_8] : memref<8x8x1xf32, #tpu.memory_space<vmem>>, vector<1x8x1xf32>
    %8 = vector.shape_cast %7 : vector<1x8x1xf32> to vector<8x1xf32>
    %9 = vector.broadcast %8 : vector<8x1xf32> to vector<8x128xf32>
    %10 = vector.broadcast %3 : vector<1x128xf32> to vector<8x128xf32>
    %11 = arith.mulf %9, %10 : vector<8x128xf32>
    %c0_9 = arith.constant 0 : index
    %c0_10 = arith.constant 0 : index
    %12 = vector.load %arg7[%c0_9, %c0_10] : memref<8x128xf32, #tpu.memory_space<vmem>>, vector<8x128xf32>
    %cst = arith.constant dense<0.000000e+00> : vector<8x128xf32>
    %13 = tpu.matmul %12, %4, %cst {dimension_numbers = #tpu.dot_dimension_numbers<[1], [0], [0], [1], [0, 0, 1, 1], [], []>} : vector<8x128xf32>, vector<128x128xf32>, vector<8x128xf32> -> vector<8x128xf32>
    %14 = arith.addf %11, %13 : vector<8x128xf32>
    %15 = vector.broadcast %5 : vector<1x128xf32> to vector<8x128xf32>
    %16 = arith.addf %14, %15 : vector<8x128xf32>
    %17 = math.tanh %16 : vector<8x128xf32>
    %c0_11 = arith.constant 0 : index
    %c0_12 = arith.constant 0 : index
    %18 = vector.load %arg7[%c0_11, %c0_12] : memref<8x128xf32, #tpu.memory_space<vmem>>, vector<8x128xf32>
    tpu.vector_store %arg7[%c0_11, %c0_12], %17 {strides = array<i32>} : memref<8x128xf32, #tpu.memory_space<vmem>>, vector<8x128xf32>,
    %19 = arith.index_cast %c0_i32_6 : i32 to index
    %c0_13 = arith.constant 0 : index
    %c0_14 = arith.constant 0 : index
    %20 = vector.load %arg6[%19, %c0_13, %c0_14] : memref<8x8x128xf32, #tpu.memory_space<vmem>>, vector<1x8x128xf32>
    %21 = vector.shape_cast %20 : vector<1x8x128xf32> to vector<8x128xf32>
    %22 = vector.shape_cast %17 : vector<8x128xf32> to vector<1x8x128xf32>
    tpu.vector_store %arg6[%19, %c0_13, %c0_14], %22 {strides = array<i32>} : memref<8x8x128xf32, #tpu.memory_space<vmem>>, vector<1x8x128xf32>,
    %c1_i32 = arith.constant 1 : i32
    %23 = arith.index_cast %c1_i32 : i32 to index
    %c0_15 = arith.constant 0 : index
    %c0_16 = arith.constant 0 : index
    %24 = vector.load %arg1[%23, %c0_15, %c0_16] : memref<8x8x1xf32, #tpu.memory_space<vmem>>, vector<1x8x1xf32>
    %25 = vector.shape_cast %24 : vector<1x8x1xf32> to vector<8x1xf32>
    %26 = vector.broadcast %25 : vector<8x1xf32> to vector<8x128xf32>
    %27 = vector.broadcast %3 : vector<1x128xf32> to vector<8x128xf32>
    %28 = arith.mulf %26, %27 : vector<8x128xf32>
    %c0_17 = arith.constant 0 : index
    %c0_18 = arith.constant 0 : index
    %29 = vector.load %arg7[%c0_17, %c0_18] : memref<8x128xf32, #tpu.memory_space<vmem>>, vector<8x128xf32>
    %cst_19 = arith.constant dense<0.000000e+00> : vector<8x128xf32>
    %30 = tpu.matmul %29, %4, %cst_19 {dimension_numbers = #tpu.dot_dimension_numbers<[1], [0], [0], [1], [0, 0, 1, 1], [], []>} : vector<8x128xf32>, vector<128x128xf32>, vector<8x128xf32> -> vector<8x128xf32>
    %31 = arith.addf %28, %30 : vector<8x128xf32>
    %32 = vector.broadcast %5 : vector<1x128xf32> to vector<8x128xf32>
    %33 = arith.addf %31, %32 : vector<8x128xf32>
    %34 = math.tanh %33 : vector<8x128xf32>
    %c0_20 = arith.constant 0 : index
    %c0_21 = arith.constant 0 : index
    %35 = vector.load %arg7[%c0_20, %c0_21] : memref<8x128xf32, #tpu.memory_space<vmem>>, vector<8x128xf32>
    tpu.vector_store %arg7[%c0_20, %c0_21], %34 {strides = array<i32>} : memref<8x128xf32, #tpu.memory_space<vmem>>, vector<8x128xf32>,
    %36 = arith.index_cast %c1_i32 : i32 to index
    %c0_22 = arith.constant 0 : index
    %c0_23 = arith.constant 0 : index
    %37 = vector.load %arg6[%36, %c0_22, %c0_23] : memref<8x8x128xf32, #tpu.memory_space<vmem>>, vector<1x8x128xf32>
    %38 = vector.shape_cast %37 : vector<1x8x128xf32> to vector<8x128xf32>
    %39 = vector.shape_cast %34 : vector<8x128xf32> to vector<1x8x128xf32>
    tpu.vector_store %arg6[%36, %c0_22, %c0_23], %39 {strides = array<i32>} : memref<8x8x128xf32, #tpu.memory_space<vmem>>, vector<1x8x128xf32>,
    %c2_i32 = arith.constant 2 : i32
    %40 = arith.index_cast %c2_i32 : i32 to index
    %c0_24 = arith.constant 0 : index
    %c0_25 = arith.constant 0 : index
    %41 = vector.load %arg1[%40, %c0_24, %c0_25] : memref<8x8x1xf32, #tpu.memory_space<vmem>>, vector<1x8x1xf32>
    %42 = vector.shape_cast %41 : vector<1x8x1xf32> to vector<8x1xf32>
    %43 = vector.broadcast %42 : vector<8x1xf32> to vector<8x128xf32>
    %44 = vector.broadcast %3 : vector<1x128xf32> to vector<8x128xf32>
    %45 = arith.mulf %43, %44 : vector<8x128xf32>
    %c0_26 = arith.constant 0 : index
    %c0_27 = arith.constant 0 : index
    %46 = vector.load %arg7[%c0_26, %c0_27] : memref<8x128xf32, #tpu.memory_space<vmem>>, vector<8x128xf32>
    %cst_28 = arith.constant dense<0.000000e+00> : vector<8x128xf32>
    %47 = tpu.matmul %46, %4, %cst_28 {dimension_numbers = #tpu.dot_dimension_numbers<[1], [0], [0], [1], [0, 0, 1, 1], [], []>} : vector<8x128xf32>, vector<128x128xf32>, vector<8x128xf32> -> vector<8x128xf32>
    %48 = arith.addf %45, %47 : vector<8x128xf32>
    %49 = vector.broadcast %5 : vector<1x128xf32> to vector<8x128xf32>
    %50 = arith.addf %48, %49 : vector<8x128xf32>
    %51 = math.tanh %50 : vector<8x128xf32>
    %c0_29 = arith.constant 0 : index
    %c0_30 = arith.constant 0 : index
    %52 = vector.load %arg7[%c0_29, %c0_30] : memref<8x128xf32, #tpu.memory_space<vmem>>, vector<8x128xf32>
    tpu.vector_store %arg7[%c0_29, %c0_30], %51 {strides = array<i32>} : memref<8x128xf32, #tpu.memory_space<vmem>>, vector<8x128xf32>,
    %53 = arith.index_cast %c2_i32 : i32 to index
    %c0_31 = arith.constant 0 : index
    %c0_32 = arith.constant 0 : index
    %54 = vector.load %arg6[%53, %c0_31, %c0_32] : memref<8x8x128xf32, #tpu.memory_space<vmem>>, vector<1x8x128xf32>
    %55 = vector.shape_cast %54 : vector<1x8x128xf32> to vector<8x128xf32>
    %56 = vector.shape_cast %51 : vector<8x128xf32> to vector<1x8x128xf32>
    tpu.vector_store %arg6[%53, %c0_31, %c0_32], %56 {strides = array<i32>} : memref<8x8x128xf32, #tpu.memory_space<vmem>>, vector<1x8x128xf32>,
    %c3_i32 = arith.constant 3 : i32
    %57 = arith.index_cast %c3_i32 : i32 to index
    %c0_33 = arith.constant 0 : index
    %c0_34 = arith.constant 0 : index
    %58 = vector.load %arg1[%57, %c0_33, %c0_34] : memref<8x8x1xf32, #tpu.memory_space<vmem>>, vector<1x8x1xf32>
    %59 = vector.shape_cast %58 : vector<1x8x1xf32> to vector<8x1xf32>
    %60 = vector.broadcast %59 : vector<8x1xf32> to vector<8x128xf32>
    %61 = vector.broadcast %3 : vector<1x128xf32> to vector<8x128xf32>
    %62 = arith.mulf %60, %61 : vector<8x128xf32>
    %c0_35 = arith.constant 0 : index
    %c0_36 = arith.constant 0 : index
    %63 = vector.load %arg7[%c0_35, %c0_36] : memref<8x128xf32, #tpu.memory_space<vmem>>, vector<8x128xf32>
    %cst_37 = arith.constant dense<0.000000e+00> : vector<8x128xf32>
    %64 = tpu.matmul %63, %4, %cst_37 {dimension_numbers = #tpu.dot_dimension_numbers<[1], [0], [0], [1], [0, 0, 1, 1], [], []>} : vector<8x128xf32>, vector<128x128xf32>, vector<8x128xf32> -> vector<8x128xf32>
    %65 = arith.addf %62, %64 : vector<8x128xf32>
    %66 = vector.broadcast %5 : vector<1x128xf32> to vector<8x128xf32>
    %67 = arith.addf %65, %66 : vector<8x128xf32>
    %68 = math.tanh %67 : vector<8x128xf32>
    %c0_38 = arith.constant 0 : index
    %c0_39 = arith.constant 0 : index
    %69 = vector.load %arg7[%c0_38, %c0_39] : memref<8x128xf32, #tpu.memory_space<vmem>>, vector<8x128xf32>
    tpu.vector_store %arg7[%c0_38, %c0_39], %68 {strides = array<i32>} : memref<8x128xf32, #tpu.memory_space<vmem>>, vector<8x128xf32>,
    %70 = arith.index_cast %c3_i32 : i32 to index
    %c0_40 = arith.constant 0 : index
    %c0_41 = arith.constant 0 : index
    %71 = vector.load %arg6[%70, %c0_40, %c0_41] : memref<8x8x128xf32, #tpu.memory_space<vmem>>, vector<1x8x128xf32>
    %72 = vector.shape_cast %71 : vector<1x8x128xf32> to vector<8x128xf32>
    %73 = vector.shape_cast %68 : vector<8x128xf32> to vector<1x8x128xf32>
    tpu.vector_store %arg6[%70, %c0_40, %c0_41], %73 {strides = array<i32>} : memref<8x8x128xf32, #tpu.memory_space<vmem>>, vector<1x8x128xf32>,
    %c4_i32 = arith.constant 4 : i32
    %74 = arith.index_cast %c4_i32 : i32 to index
    %c0_42 = arith.constant 0 : index
    %c0_43 = arith.constant 0 : index
    %75 = vector.load %arg1[%74, %c0_42, %c0_43] : memref<8x8x1xf32, #tpu.memory_space<vmem>>, vector<1x8x1xf32>
    %76 = vector.shape_cast %75 : vector<1x8x1xf32> to vector<8x1xf32>
    %77 = vector.broadcast %76 : vector<8x1xf32> to vector<8x128xf32>
    %78 = vector.broadcast %3 : vector<1x128xf32> to vector<8x128xf32>
    %79 = arith.mulf %77, %78 : vector<8x128xf32>
    %c0_44 = arith.constant 0 : index
    %c0_45 = arith.constant 0 : index
    %80 = vector.load %arg7[%c0_44, %c0_45] : memref<8x128xf32, #tpu.memory_space<vmem>>, vector<8x128xf32>
    %cst_46 = arith.constant dense<0.000000e+00> : vector<8x128xf32>
    %81 = tpu.matmul %80, %4, %cst_46 {dimension_numbers = #tpu.dot_dimension_numbers<[1], [0], [0], [1], [0, 0, 1, 1], [], []>} : vector<8x128xf32>, vector<128x128xf32>, vector<8x128xf32> -> vector<8x128xf32>
    %82 = arith.addf %79, %81 : vector<8x128xf32>
    %83 = vector.broadcast %5 : vector<1x128xf32> to vector<8x128xf32>
    %84 = arith.addf %82, %83 : vector<8x128xf32>
    %85 = math.tanh %84 : vector<8x128xf32>
    %c0_47 = arith.constant 0 : index
    %c0_48 = arith.constant 0 : index
    %86 = vector.load %arg7[%c0_47, %c0_48] : memref<8x128xf32, #tpu.memory_space<vmem>>, vector<8x128xf32>
    tpu.vector_store %arg7[%c0_47, %c0_48], %85 {strides = array<i32>} : memref<8x128xf32, #tpu.memory_space<vmem>>, vector<8x128xf32>,
    %87 = arith.index_cast %c4_i32 : i32 to index
    %c0_49 = arith.constant 0 : index
    %c0_50 = arith.constant 0 : index
    %88 = vector.load %arg6[%87, %c0_49, %c0_50] : memref<8x8x128xf32, #tpu.memory_space<vmem>>, vector<1x8x128xf32>
    %89 = vector.shape_cast %88 : vector<1x8x128xf32> to vector<8x128xf32>
    %90 = vector.shape_cast %85 : vector<8x128xf32> to vector<1x8x128xf32>
    tpu.vector_store %arg6[%87, %c0_49, %c0_50], %90 {strides = array<i32>} : memref<8x8x128xf32, #tpu.memory_space<vmem>>, vector<1x8x128xf32>,
    %c5_i32 = arith.constant 5 : i32
    %91 = arith.index_cast %c5_i32 : i32 to index
    %c0_51 = arith.constant 0 : index
    %c0_52 = arith.constant 0 : index
    %92 = vector.load %arg1[%91, %c0_51, %c0_52] : memref<8x8x1xf32, #tpu.memory_space<vmem>>, vector<1x8x1xf32>
    %93 = vector.shape_cast %92 : vector<1x8x1xf32> to vector<8x1xf32>
    %94 = vector.broadcast %93 : vector<8x1xf32> to vector<8x128xf32>
    %95 = vector.broadcast %3 : vector<1x128xf32> to vector<8x128xf32>
    %96 = arith.mulf %94, %95 : vector<8x128xf32>
    %c0_53 = arith.constant 0 : index
    %c0_54 = arith.constant 0 : index
    %97 = vector.load %arg7[%c0_53, %c0_54] : memref<8x128xf32, #tpu.memory_space<vmem>>, vector<8x128xf32>
    %cst_55 = arith.constant dense<0.000000e+00> : vector<8x128xf32>
    %98 = tpu.matmul %97, %4, %cst_55 {dimension_numbers = #tpu.dot_dimension_numbers<[1], [0], [0], [1], [0, 0, 1, 1], [], []>} : vector<8x128xf32>, vector<128x128xf32>, vector<8x128xf32> -> vector<8x128xf32>
    %99 = arith.addf %96, %98 : vector<8x128xf32>
    %100 = vector.broadcast %5 : vector<1x128xf32> to vector<8x128xf32>
    %101 = arith.addf %99, %100 : vector<8x128xf32>
    %102 = math.tanh %101 : vector<8x128xf32>
    %c0_56 = arith.constant 0 : index
    %c0_57 = arith.constant 0 : index
    %103 = vector.load %arg7[%c0_56, %c0_57] : memref<8x128xf32, #tpu.memory_space<vmem>>, vector<8x128xf32>
    tpu.vector_store %arg7[%c0_56, %c0_57], %102 {strides = array<i32>} : memref<8x128xf32, #tpu.memory_space<vmem>>, vector<8x128xf32>,
    %104 = arith.index_cast %c5_i32 : i32 to index
    %c0_58 = arith.constant 0 : index
    %c0_59 = arith.constant 0 : index
    %105 = vector.load %arg6[%104, %c0_58, %c0_59] : memref<8x8x128xf32, #tpu.memory_space<vmem>>, vector<1x8x128xf32>
    %106 = vector.shape_cast %105 : vector<1x8x128xf32> to vector<8x128xf32>
    %107 = vector.shape_cast %102 : vector<8x128xf32> to vector<1x8x128xf32>
    tpu.vector_store %arg6[%104, %c0_58, %c0_59], %107 {strides = array<i32>} : memref<8x8x128xf32, #tpu.memory_space<vmem>>, vector<1x8x128xf32>,
    %c6_i32 = arith.constant 6 : i32
    %108 = arith.index_cast %c6_i32 : i32 to index
    %c0_60 = arith.constant 0 : index
    %c0_61 = arith.constant 0 : index
    %109 = vector.load %arg1[%108, %c0_60, %c0_61] : memref<8x8x1xf32, #tpu.memory_space<vmem>>, vector<1x8x1xf32>
    %110 = vector.shape_cast %109 : vector<1x8x1xf32> to vector<8x1xf32>
    %111 = vector.broadcast %110 : vector<8x1xf32> to vector<8x128xf32>
    %112 = vector.broadcast %3 : vector<1x128xf32> to vector<8x128xf32>
    %113 = arith.mulf %111, %112 : vector<8x128xf32>
    %c0_62 = arith.constant 0 : index
    %c0_63 = arith.constant 0 : index
    %114 = vector.load %arg7[%c0_62, %c0_63] : memref<8x128xf32, #tpu.memory_space<vmem>>, vector<8x128xf32>
    %cst_64 = arith.constant dense<0.000000e+00> : vector<8x128xf32>
    %115 = tpu.matmul %114, %4, %cst_64 {dimension_numbers = #tpu.dot_dimension_numbers<[1], [0], [0], [1], [0, 0, 1, 1], [], []>} : vector<8x128xf32>, vector<128x128xf32>, vector<8x128xf32> -> vector<8x128xf32>
    %116 = arith.addf %113, %115 : vector<8x128xf32>
    %117 = vector.broadcast %5 : vector<1x128xf32> to vector<8x128xf32>
    %118 = arith.addf %116, %117 : vector<8x128xf32>
    %119 = math.tanh %118 : vector<8x128xf32>
    %c0_65 = arith.constant 0 : index
    %c0_66 = arith.constant 0 : index
    %120 = vector.load %arg7[%c0_65, %c0_66] : memref<8x128xf32, #tpu.memory_space<vmem>>, vector<8x128xf32>
    tpu.vector_store %arg7[%c0_65, %c0_66], %119 {strides = array<i32>} : memref<8x128xf32, #tpu.memory_space<vmem>>, vector<8x128xf32>,
    %121 = arith.index_cast %c6_i32 : i32 to index
    %c0_67 = arith.constant 0 : index
    %c0_68 = arith.constant 0 : index
    %122 = vector.load %arg6[%121, %c0_67, %c0_68] : memref<8x8x128xf32, #tpu.memory_space<vmem>>, vector<1x8x128xf32>
    %123 = vector.shape_cast %122 : vector<1x8x128xf32> to vector<8x128xf32>
    %124 = vector.shape_cast %119 : vector<8x128xf32> to vector<1x8x128xf32>
    tpu.vector_store %arg6[%121, %c0_67, %c0_68], %124 {strides = array<i32>} : memref<8x8x128xf32, #tpu.memory_space<vmem>>, vector<1x8x128xf32>,
    %c7_i32 = arith.constant 7 : i32
    %125 = arith.index_cast %c7_i32 : i32 to index
    %c0_69 = arith.constant 0 : index
    %c0_70 = arith.constant 0 : index
    %126 = vector.load %arg1[%125, %c0_69, %c0_70] : memref<8x8x1xf32, #tpu.memory_space<vmem>>, vector<1x8x1xf32>
    %127 = vector.shape_cast %126 : vector<1x8x1xf32> to vector<8x1xf32>
    %128 = vector.broadcast %127 : vector<8x1xf32> to vector<8x128xf32>
    %129 = vector.broadcast %3 : vector<1x128xf32> to vector<8x128xf32>
    %130 = arith.mulf %128, %129 : vector<8x128xf32>
    %c0_71 = arith.constant 0 : index
    %c0_72 = arith.constant 0 : index
    %131 = vector.load %arg7[%c0_71, %c0_72] : memref<8x128xf32, #tpu.memory_space<vmem>>, vector<8x128xf32>
    %cst_73 = arith.constant dense<0.000000e+00> : vector<8x128xf32>
    %132 = tpu.matmul %131, %4, %cst_73 {dimension_numbers = #tpu.dot_dimension_numbers<[1], [0], [0], [1], [0, 0, 1, 1], [], []>} : vector<8x128xf32>, vector<128x128xf32>, vector<8x128xf32> -> vector<8x128xf32>
    %133 = arith.addf %130, %132 : vector<8x128xf32>
    %134 = vector.broadcast %5 : vector<1x128xf32> to vector<8x128xf32>
    %135 = arith.addf %133, %134 : vector<8x128xf32>
    %136 = math.tanh %135 : vector<8x128xf32>
    %c0_74 = arith.constant 0 : index
    %c0_75 = arith.constant 0 : index
    %137 = vector.load %arg7[%c0_74, %c0_75] : memref<8x128xf32, #tpu.memory_space<vmem>>, vector<8x128xf32>
    tpu.vector_store %arg7[%c0_74, %c0_75], %136 {strides = array<i32>} : memref<8x128xf32, #tpu.memory_space<vmem>>, vector<8x128xf32>,
    %138 = arith.index_cast %c7_i32 : i32 to index
    %c0_76 = arith.constant 0 : index
    %c0_77 = arith.constant 0 : index
    %139 = vector.load %arg6[%138, %c0_76, %c0_77] : memref<8x8x128xf32, #tpu.memory_space<vmem>>, vector<1x8x128xf32>
    %140 = vector.shape_cast %139 : vector<1x8x128xf32> to vector<8x128xf32>
    %141 = vector.shape_cast %136 : vector<8x128xf32> to vector<1x8x128xf32>
    tpu.vector_store %arg6[%138, %c0_76, %c0_77], %141 {strides = array<i32>} : memref<8x8x128xf32, #tpu.memory_space<vmem>>, vector<1x8x128xf32>,
    %c8_i32 = arith.constant 8 : i32
    return
  }
  func.func @transform_0(%arg0: i32) -> (i32, i32, i32) {
    %c0_i32 = arith.constant 0 : i32
    %c0_i32_0 = arith.constant 0 : i32
    %c0_i32_1 = arith.constant 0 : i32
    return %arg0, %c0_i32, %c0_i32_0 : i32, i32, i32
  }
  func.func @transform_1(%arg0: i32) -> (i32, i32) {
    %c0_i32 = arith.constant 0 : i32
    %c0_i32_0 = arith.constant 0 : i32
    %c0_i32_1 = arith.constant 0 : i32
    return %c0_i32, %c0_i32_0 : i32, i32
  }
  func.func @transform_2(%arg0: i32) -> (i32, i32) {
    %c0_i32 = arith.constant 0 : i32
    %c0_i32_0 = arith.constant 0 : i32
    %c0_i32_1 = arith.constant 0 : i32
    return %c0_i32, %c0_i32_0 : i32, i32
  }
  func.func @transform_3(%arg0: i32) -> (i32, i32) {
    %c0_i32 = arith.constant 0 : i32
    %c0_i32_0 = arith.constant 0 : i32
    %c0_i32_1 = arith.constant 0 : i32
    return %c0_i32, %c0_i32_0 : i32, i32
  }
  func.func @transform_4(%arg0: i32) -> (i32, i32) {
    %c0_i32 = arith.constant 0 : i32
    %c0_i32_0 = arith.constant 0 : i32
    %c0_i32_1 = arith.constant 0 : i32
    return %c0_i32, %c0_i32_0 : i32, i32
  }
  func.func @transform_5(%arg0: i32) -> (i32, i32, i32) {
    %c0_i32 = arith.constant 0 : i32
    %c0_i32_0 = arith.constant 0 : i32
    %c0_i32_1 = arith.constant 0 : i32
    return %arg0, %c0_i32, %c0_i32_0 : i32, i32, i32
  }
}

</mosaic_0001>

<bundles_post_ra>
// kernel: vanilla_rnn_forward.1
= control target key start
LH: loop header
LB: loop body
LE: loop exit
PB: predicated region body
PF: predicated region fallthrough
CT: control target
= control target key end

     0   :  { %v1191_v0 = vmov 0.0   ;;  %vm1192_vm0 = vmmov 0   ;;  %v1193_v3 = vmov 0   ;;  %s1655_s3 = inlined_call_operand.vmem [shape: f32[128,128], index: 3, kind: input, shape index: {}]   ;;  %s1656_s0 = inlined_call_operand.vmem [shape: f32[8,8,1], index: 0, kind: input, shape index: {}]   ;;  %s1657_s1 = inlined_call_operand.vmem [shape: f32[8,128], index: 1, kind: input, shape index: {}]   ;;  %s1658_s2 = inlined_call_operand.vmem [shape: f32[1,128], index: 2, kind: input, shape index: {}]   ;;  %s1659_s4 = inlined_call_operand.vmem [shape: f32[1,128], index: 4, kind: input, shape index: {}]   ;;  %s1660_s5 = inlined_call_operand.vmem [shape: f32[8,8,128], index: 5, kind: output, shape index: {}]  }
   0x1   :  { %890 = vmatprep.subr.mxu0 %v1191_v0  ;;  %v1228_v1 = vld [vmem:[%s1655_s3 + $0x78] sm:$0xff]  ;;  %v1233_v2 = vld [vmem:[%s1655_s3 + $0x70] sm:$0xff]  ;;  %922 = vmatprep.mubr.msk.f32.mxu0 %vm1192_vm0, %v1191_v0  ;;  %v1243_v4 = vld [vmem:[%s1655_s3 + $0x68] sm:$0xff] }
   0x2   :  { %891 = vmatpush3.msra.mxu0 %v1228_v1  ;;  %1173 = vset.pattern.permute.xlu0 %v1193_v3  ;;  %v1252_v5 = vld [vmem:[%s1655_s3 + $0x60] sm:$0xff]  ;;  %v1264_v7 = vld [vmem:[%s1655_s3 + $0x58] sm:$0xff]  ;;  %v740_v8 = vld [vmem:[%s1656_s0 + $0x8] sm:$0xff] }
   0x3   :  { %892 = vmatprep.subr.mxu0 %v1191_v0  ;;  %925 = vmatprep.subr.mxu1 %v1191_v0  ;;  %v44_v6 = vld [vmem:[%s1656_s0] sm:$0xff]  ;;  %v1275_v9 = vld [vmem:[%s1655_s3 + $0x50] sm:$0xff]  ;;  %v1284_v10 = vld [vmem:[%s1655_s3 + $0x48] sm:$0xff] }
   0x4   :  { %893 = vmatpush3.msra.mxu0 %v1233_v2  ;;  %926 = vmatpush3.msra.mxu1 %v1228_v1  ;;  %v746_v11 = vld [vmem:[%s1656_s0 + $0x20] sm:$0xff]  ;;  %v1304_v13 = vld [vmem:[%s1655_s3 + $0x38] sm:$0xff]  ;;  %v750_v14 = vld [vmem:[%s1656_s0 + $0x30] sm:$0xff] }
   0x5   :  { %894 = vmatprep.subr.mxu0 %v1191_v0  ;;  %927 = vmatprep.subr.mxu1 %v1191_v0  ;;  %v1295_v12 = vld [vmem:[%s1655_s3 + $0x40] sm:$0xff]  ;;  %v1315_v15 = vld [vmem:[%s1655_s3 + $0x30] sm:$0xff]  ;;  %v1324_v16 = vld [vmem:[%s1655_s3 + $0x28] sm:$0xff] }
   0x6   :  { %895 = vmatpush3.msra.mxu0 %v1243_v4  ;;  %928 = vmatpush3.msra.mxu1 %v1233_v2  ;;  %v1332_v17 = vld [vmem:[%s1655_s3 + $0x20] sm:$0xff]  ;;  %v1341_v18 = vld [vmem:[%s1655_s3 + $0x18] sm:$0xff]  ;;  %v1350_v19 = vld [vmem:[%s1655_s3 + $0x10] sm:$0xff] }
   0x7   :  { %896 = vmatprep.subr.mxu0 %v1191_v0  ;;  %47 = vperm.xlu0 %1173, %v44_v6   ;;  %v1359_v20 = vld [vmem:[%s1655_s3 + $0x8] sm:$0xff]  ;;  %v1368_v21 = vld [vmem:[%s1655_s3] sm:$0xff]  ;;  %v742_v32 = vld [vmem:[%s1656_s0 + $0x10] sm:$0xff] }
   0x8   :  { %897 = vmatpush3.msra.mxu0 %v1252_v5  ;;  %929 = vmatprep.subr.mxu1 %v1191_v0  ;;  %v24_v22 = vld [vmem:[%s1657_s1] sm:$0xff]  ;;  %v744_v33 = vld [vmem:[%s1656_s0 + $0x18] sm:$0xff]  ;;  %v748_v34 = vld [vmem:[%s1656_s0 + $0x28] sm:$0xff] }
   0x9   :  { %898 = vmatprep.subr.mxu0 %v1191_v0  ;;  %930 = vmatpush3.msra.mxu1 %v1243_v4  ;;  %v1428_v23 = vld [vmem:[%s1658_s2] ss:$0 sm:$0xff]  ;;  %v752_v35 = vld [vmem:[%s1656_s0 + $0x38] sm:$0xff] }
   0xa   :  { %899 = vmatpush3.msra.mxu0 %v1264_v7  ;;  %931 = vmatprep.subr.mxu1 %v1191_v0  ;;  %v1434_v26 = vld [vmem:[%s1659_s4] ss:$0 sm:$0xff] }
   0xb   :  { %900 = vmatprep.subr.mxu0 %v1191_v0  ;;  %143 = vperm.xlu0 %1173, %v740_v8  }
   0xc   :  { %901 = vmatpush3.msra.mxu0 %v1275_v9  ;;  %932 = vmatpush3.msra.mxu1 %v1252_v5 }
   0xd   :  { %902 = vmatprep.subr.mxu0 %v1191_v0  ;;  %933 = vmatprep.subr.mxu1 %v1191_v0 }
   0xe   :  { %903 = vmatpush3.msra.mxu0 %v1284_v10  ;;  %934 = vmatpush3.msra.mxu1 %v1264_v7 }
   0xf   :  { %904 = vmatprep.subr.mxu0 %v1191_v0  ;;  %398 = vperm.xlu0 %1173, %v746_v11  }
  0x10   :  { %905 = vmatpush3.msra.mxu0 %v1295_v12  ;;  %935 = vmatprep.subr.mxu1 %v1191_v0 }
  0x11   :  { %906 = vmatprep.subr.mxu0 %v1191_v0  ;;  %936 = vmatpush3.msra.mxu1 %v1275_v9 }
  0x12   :  { %907 = vmatpush3.msra.mxu0 %v1304_v13  ;;  %937 = vmatprep.subr.mxu1 %v1191_v0 }
  0x13   :  { %908 = vmatprep.subr.mxu0 %v1191_v0  ;;  %568 = vperm.xlu0 %1173, %v750_v14  }
  0x14   :  { %909 = vmatpush3.msra.mxu0 %v1315_v15  ;;  %938 = vmatpush3.msra.mxu1 %v1284_v10 }
  0x15   :  { %910 = vmatprep.subr.mxu0 %v1191_v0  ;;  %939 = vmatprep.subr.mxu1 %v1191_v0 }
  0x16   :  { %911 = vmatpush3.msra.mxu0 %v1324_v16  ;;  %940 = vmatpush3.msra.mxu1 %v1295_v12 }
  0x17   :  { %912 = vmatprep.subr.mxu0 %v1191_v0  ;;  %941 = vmatprep.subr.mxu1 %v1191_v0 }
  0x18   :  { %913 = vmatpush3.msra.mxu0 %v1332_v17  ;;  %942 = vmatpush3.msra.mxu1 %v1304_v13 }
  0x19   :  { %914 = vmatprep.subr.mxu0 %v1191_v0  ;;  %943 = vmatprep.subr.mxu1 %v1191_v0 }
  0x1a   :  { %915 = vmatpush3.msra.mxu0 %v1341_v18  ;;  %944 = vmatpush3.msra.mxu1 %v1315_v15 }
  0x1b   :  { %916 = vmatprep.subr.mxu0 %v1191_v0  ;;  %945 = vmatprep.subr.mxu1 %v1191_v0 }
  0x1c   :  { %917 = vmatpush3.msra.mxu0 %v1350_v19  ;;  %946 = vmatpush3.msra.mxu1 %v1324_v16 }
  0x1d   :  { %918 = vmatprep.subr.mxu0 %v1191_v0  ;;  %947 = vmatprep.subr.mxu1 %v1191_v0 }
  0x1e   :  { %919 = vmatpush3.msra.mxu0 %v1359_v20  ;;  %948 = vmatpush3.msra.mxu1 %v1332_v17 }
  0x1f   :  { %920 = vmatprep.subr.mxu0 %v1191_v0  ;;  %949 = vmatprep.subr.mxu1 %v1191_v0 }
  0x20   :  { %921 = vmatpush3.msra.mxu0 %v1368_v21  ;;  %950 = vmatpush3.msra.mxu1 %v1341_v18 }
  0x21   :  { %923 = vmatmul.mubr.f32.vlgmr.msra.gmra.mxu0 %v24_v22  ;;  %951 = vmatprep.subr.mxu1 %v1191_v0 }
  0x22   :  { %952 = vmatpush3.msra.mxu1 %v1350_v19  ;;  %957 = vmatprep.mubr.msk.f32.mxu1 %vm1192_vm0, %v1191_v0 }
  0x23   :  { %953 = vmatprep.subr.mxu1 %v1191_v0  ;;  %960 = vmatprep.subr.mxu0 %v1191_v0 }
  0x24   :  { %954 = vmatpush3.msra.mxu1 %v1359_v20  ;;  %961 = vmatpush3.msra.mxu0 %v1228_v1 }
  0x25   :  { %955 = vmatprep.subr.mxu1 %v1191_v0  ;;  %962 = vmatprep.subr.mxu0 %v1191_v0 }
  0x26   :  { %956 = vmatpush3.msra.mxu1 %v1368_v21  ;;  %963 = vmatpush3.msra.mxu0 %v1233_v2 }
  0x27   :  { %964 = vmatprep.subr.mxu0 %v1191_v0  ;;  %992 = vmatprep.mubr.msk.f32.mxu0 %vm1192_vm0, %v1191_v0 }
  0x28   :  { %965 = vmatpush3.msra.mxu0 %v1243_v4  ;;  %1174 = vset.pattern.permute.xlu1 %v1193_v3 }
  0x29   :  { %966 = vmatprep.subr.mxu0 %v1191_v0  ;;  %995 = vmatprep.subr.mxu1 %v1191_v0 }
  0x2a   :  { %967 = vmatpush3.msra.mxu0 %v1252_v5  ;;  %228 = vperm.xlu1 %1174, %v742_v32  }
  0x2b   :  { %968 = vmatprep.subr.mxu0 %v1191_v0 }
  0x2c   :  { %969 = vmatpush3.msra.mxu0 %v1264_v7 }
  0x2d   :  { %970 = vmatprep.subr.mxu0 %v1191_v0 }
  0x2e   :  { %971 = vmatpush3.msra.mxu0 %v1275_v9  ;;  %313 = vperm.xlu1 %1174, %v744_v33  }
  0x2f   :  { %972 = vmatprep.subr.mxu0 %v1191_v0 }
  0x30   :  { %973 = vmatpush3.msra.mxu0 %v1284_v10 }
  0x31   :  { %974 = vmatprep.subr.mxu0 %v1191_v0 }
  0x32   :  { %975 = vmatpush3.msra.mxu0 %v1295_v12  ;;  %483 = vperm.xlu1 %1174, %v748_v34  }
  0x33   :  { %976 = vmatprep.subr.mxu0 %v1191_v0 }
  0x34   :  { %977 = vmatpush3.msra.mxu0 %v1304_v13 }
  0x35   :  { %978 = vmatprep.subr.mxu0 %v1191_v0 }
  0x36   :  { %979 = vmatpush3.msra.mxu0 %v1315_v15  ;;  %653 = vperm.xlu1 %1174, %v752_v35  }
  0x37   :  { %980 = vmatprep.subr.mxu0 %v1191_v0 }
  0x38   :  { %981 = vmatpush3.msra.mxu0 %v1324_v16 }
  0x39   :  { %982 = vmatprep.subr.mxu0 %v1191_v0 }
  0x3a   :  { %983 = vmatpush3.msra.mxu0 %v1332_v17 }
  0x3b   :  { %984 = vmatprep.subr.mxu0 %v1191_v0 }
  0x3c   :  { %985 = vmatpush3.msra.mxu0 %v1341_v18 }
  0x3d   :  { %986 = vmatprep.subr.mxu0 %v1191_v0 }
  0x3e   :  { %987 = vmatpush3.msra.mxu0 %v1350_v19 }
  0x3f   :  { %988 = vmatprep.subr.mxu0 %v1191_v0 }
  0x40   :  { %989 = vmatpush3.msra.mxu0 %v1359_v20 }
  0x41   :  { %990 = vmatprep.subr.mxu0 %v1191_v0 }
  0x42   :  { %991 = vmatpush3.msra.mxu0 %v1368_v21 }
  0x43   :  { %1030 = vmatprep.subr.mxu0 %v1191_v0 }
  0x82   :  { %v48_v24 = vpop.permute.xlu0 %47 }
  0x83   :  { %v56_v25 = vmul.f32 %v1428_v23, %v48_v24 }
  0x86   :  { %v144_v36 = vpop.permute.xlu0 %143 }
  0x87   :  { %v146_v37 = vmul.f32 %v1428_v23, %v144_v36 }
  0x8a   :  { %v399_v57 = vpop.permute.xlu0 %398 }
  0x8b   :  { %v401_v58 = vmul.f32 %v1428_v23, %v399_v57 }
  0x8e   :  { %v569_v8 = vpop.permute.xlu0 %568 }
  0xa5   :  { %v229_v43 = vpop.permute.xlu1 %228 }
  0xa6   :  { %v231_v44 = vmul.f32 %v1428_v23, %v229_v43 }
  0xa9   :  { %v314_v50 = vpop.permute.xlu1 %313 }
  0xaa   :  { %v316_v51 = vmul.f32 %v1428_v23, %v314_v50 }
  0xe1   :  { %v124_v27 = vpop.f32.mrf.mxu0 }
  0xe2   :  { %v128_v28 = vadd.f32 %v124_v27, %v56_v25 }
  0xe3   :  { %v924_v29 = vpop.f32.mrf.mxu0 }
  0xe4   :  { %v135_v30 = vadd.f32 %v1434_v26, %v128_v28 }
  0xe6   :  { %1175 = vtanh.f32 %v135_v30 }
  0xf3   :  { %v1176_v31 = vpop.eup %1175 }
  0xf4   :  { %138 = vst [vmem:[%s1660_s5] sm:$0xff] %v1176_v31  ;;  %958 = vmatmul.mubr.f32.vlgmr.msra.gmra.mxu1 %v1176_v31 }
  0xf5   :  { %996 = vmatpush3.msra.mxu1 %v1228_v1  ;;  %1027 = vmatprep.mubr.msk.f32.mxu1 %vm1192_vm0, %v1191_v0 }
  0xf6   :  { %997 = vmatprep.subr.mxu1 %v1191_v0 }
  0xf7   :  { %998 = vmatpush3.msra.mxu1 %v1233_v2 }
  0xf8   :  { %999 = vmatprep.subr.mxu1 %v1191_v0 }
  0xf9   :  { %1000 = vmatpush3.msra.mxu1 %v1243_v4 }
  0xfa   :  { %1001 = vmatprep.subr.mxu1 %v1191_v0 }
  0xfb   :  { %1002 = vmatpush3.msra.mxu1 %v1252_v5 }
  0xfc   :  { %1003 = vmatprep.subr.mxu1 %v1191_v0 }
  0xfd   :  { %1004 = vmatpush3.msra.mxu1 %v1264_v7 }
  0xfe   :  { %1005 = vmatprep.subr.mxu1 %v1191_v0 }
  0xff   :  { %1006 = vmatpush3.msra.mxu1 %v1275_v9 }
 0x100   :  { %1007 = vmatprep.subr.mxu1 %v1191_v0 }
 0x101   :  { %1008 = vmatpush3.msra.mxu1 %v1284_v10 }
 0x102   :  { %1009 = vmatprep.subr.mxu1 %v1191_v0 }
 0x103   :  { %1010 = vmatpush3.msra.mxu1 %v1295_v12 }
 0x104   :  { %1011 = vmatprep.subr.mxu1 %v1191_v0 }
 0x105   :  { %1012 = vmatpush3.msra.mxu1 %v1304_v13 }
 0x106   :  { %1013 = vmatprep.subr.mxu1 %v1191_v0 }
 0x107   :  { %1014 = vmatpush3.msra.mxu1 %v1315_v15 }
 0x108   :  { %1015 = vmatprep.subr.mxu1 %v1191_v0 }
 0x109   :  { %1016 = vmatpush3.msra.mxu1 %v1324_v16 }
 0x10a   :  { %1017 = vmatprep.subr.mxu1 %v1191_v0 }
 0x10b   :  { %1018 = vmatpush3.msra.mxu1 %v1332_v17 }
 0x10c   :  { %1019 = vmatprep.subr.mxu1 %v1191_v0 }
 0x10d   :  { %1020 = vmatpush3.msra.mxu1 %v1341_v18 }
 0x10e   :  { %1021 = vmatprep.subr.mxu1 %v1191_v0 }
 0x10f   :  { %1022 = vmatpush3.msra.mxu1 %v1350_v19 }
 0x110   :  { %1023 = vmatprep.subr.mxu1 %v1191_v0 }
 0x111   :  { %1024 = vmatpush3.msra.mxu1 %v1359_v20 }
 0x112   :  { %1025 = vmatprep.subr.mxu1 %v1191_v0 }
 0x113   :  { %1026 = vmatpush3.msra.mxu1 %v1368_v21 }
 0x114   :  { %1065 = vmatprep.subr.mxu1 %v1191_v0 }
 0x1b4   :  { %v214_v38 = vpop.f32.mrf.mxu1 }
 0x1b5   :  { %v218_v39 = vadd.f32 %v214_v38, %v146_v37 }
 0x1b6   :  { %v959_v40 = vpop.f32.mrf.mxu1 }
 0x1b7   :  { %v219_v41 = vadd.f32 %v1434_v26, %v218_v39 }
 0x1b9   :  { %1177 = vtanh.f32 %v219_v41 }
 0x1c6   :  { %v1178_v42 = vpop.eup %1177 }
 0x1c7   :  { %741 = vst [vmem:[%s1660_s5 + $0x8] sm:$0xff] %v1178_v42  ;;  %993 = vmatmul.mubr.f32.vlgmr.msra.gmra.mxu0 %v1178_v42 }
 0x1c8   :  { %1031 = vmatpush3.msra.mxu0 %v1228_v1  ;;  %1062 = vmatprep.mubr.msk.f32.mxu0 %vm1192_vm0, %v1191_v0 }
 0x1c9   :  { %1032 = vmatprep.subr.mxu0 %v1191_v0 }
 0x1ca   :  { %1033 = vmatpush3.msra.mxu0 %v1233_v2 }
 0x1cb   :  { %1034 = vmatprep.subr.mxu0 %v1191_v0 }
 0x1cc   :  { %1035 = vmatpush3.msra.mxu0 %v1243_v4 }
 0x1cd   :  { %1036 = vmatprep.subr.mxu0 %v1191_v0 }
 0x1ce   :  { %1037 = vmatpush3.msra.mxu0 %v1252_v5 }
 0x1cf   :  { %1038 = vmatprep.subr.mxu0 %v1191_v0 }
 0x1d0   :  { %1039 = vmatpush3.msra.mxu0 %v1264_v7 }
 0x1d1   :  { %1040 = vmatprep.subr.mxu0 %v1191_v0 }
 0x1d2   :  { %1041 = vmatpush3.msra.mxu0 %v1275_v9 }
 0x1d3   :  { %1042 = vmatprep.subr.mxu0 %v1191_v0 }
 0x1d4   :  { %1043 = vmatpush3.msra.mxu0 %v1284_v10 }
 0x1d5   :  { %1044 = vmatprep.subr.mxu0 %v1191_v0 }
 0x1d6   :  { %1045 = vmatpush3.msra.mxu0 %v1295_v12 }
 0x1d7   :  { %1046 = vmatprep.subr.mxu0 %v1191_v0 }
 0x1d8   :  { %1047 = vmatpush3.msra.mxu0 %v1304_v13 }
 0x1d9   :  { %1048 = vmatprep.subr.mxu0 %v1191_v0 }
 0x1da   :  { %1049 = vmatpush3.msra.mxu0 %v1315_v15 }
 0x1db   :  { %1050 = vmatprep.subr.mxu0 %v1191_v0 }
 0x1dc   :  { %1051 = vmatpush3.msra.mxu0 %v1324_v16 }
 0x1dd   :  { %1052 = vmatprep.subr.mxu0 %v1191_v0 }
 0x1de   :  { %1053 = vmatpush3.msra.mxu0 %v1332_v17 }
 0x1df   :  { %1054 = vmatprep.subr.mxu0 %v1191_v0 }
 0x1e0   :  { %1055 = vmatpush3.msra.mxu0 %v1341_v18 }
 0x1e1   :  { %1056 = vmatprep.subr.mxu0 %v1191_v0 }
 0x1e2   :  { %1057 = vmatpush3.msra.mxu0 %v1350_v19 }
 0x1e3   :  { %1058 = vmatprep.subr.mxu0 %v1191_v0 }
 0x1e4   :  { %1059 = vmatpush3.msra.mxu0 %v1359_v20 }
 0x1e5   :  { %1060 = vmatprep.subr.mxu0 %v1191_v0 }
 0x1e6   :  { %1061 = vmatpush3.msra.mxu0 %v1368_v21 }
 0x1e7   :  { %1100 = vmatprep.subr.mxu0 %v1191_v0 }
 0x287   :  { %v299_v45 = vpop.f32.mrf.mxu0 }
 0x288   :  { %v303_v46 = vadd.f32 %v299_v45, %v231_v44 }
 0x289   :  { %v994_v47 = vpop.f32.mrf.mxu0 }
 0x28a   :  { %v304_v48 = vadd.f32 %v1434_v26, %v303_v46 }
 0x28c   :  { %1179 = vtanh.f32 %v304_v48 }
 0x299   :  { %v1180_v49 = vpop.eup %1179 }
 0x29a   :  { %743 = vst [vmem:[%s1660_s5 + $0x10] sm:$0xff] %v1180_v49  ;;  %1028 = vmatmul.mubr.f32.vlgmr.msra.gmra.mxu1 %v1180_v49 }
 0x29b   :  { %1066 = vmatpush3.msra.mxu1 %v1228_v1  ;;  %1097 = vmatprep.mubr.msk.f32.mxu1 %vm1192_vm0, %v1191_v0 }
 0x29c   :  { %1067 = vmatprep.subr.mxu1 %v1191_v0 }
 0x29d   :  { %1068 = vmatpush3.msra.mxu1 %v1233_v2 }
 0x29e   :  { %1069 = vmatprep.subr.mxu1 %v1191_v0 }
 0x29f   :  { %1070 = vmatpush3.msra.mxu1 %v1243_v4 }
 0x2a0   :  { %1071 = vmatprep.subr.mxu1 %v1191_v0 }
 0x2a1   :  { %1072 = vmatpush3.msra.mxu1 %v1252_v5 }
 0x2a2   :  { %1073 = vmatprep.subr.mxu1 %v1191_v0 }
 0x2a3   :  { %1074 = vmatpush3.msra.mxu1 %v1264_v7 }
 0x2a4   :  { %1075 = vmatprep.subr.mxu1 %v1191_v0 }
 0x2a5   :  { %1076 = vmatpush3.msra.mxu1 %v1275_v9 }
 0x2a6   :  { %1077 = vmatprep.subr.mxu1 %v1191_v0 }
 0x2a7   :  { %1078 = vmatpush3.msra.mxu1 %v1284_v10 }
 0x2a8   :  { %1079 = vmatprep.subr.mxu1 %v1191_v0 }
 0x2a9   :  { %1080 = vmatpush3.msra.mxu1 %v1295_v12 }
 0x2aa   :  { %1081 = vmatprep.subr.mxu1 %v1191_v0 }
 0x2ab   :  { %1082 = vmatpush3.msra.mxu1 %v1304_v13 }
 0x2ac   :  { %1083 = vmatprep.subr.mxu1 %v1191_v0 }
 0x2ad   :  { %1084 = vmatpush3.msra.mxu1 %v1315_v15 }
 0x2ae   :  { %1085 = vmatprep.subr.mxu1 %v1191_v0 }
 0x2af   :  { %1086 = vmatpush3.msra.mxu1 %v1324_v16 }
 0x2b0   :  { %1087 = vmatprep.subr.mxu1 %v1191_v0 }
 0x2b1   :  { %1088 = vmatpush3.msra.mxu1 %v1332_v17 }
 0x2b2   :  { %1089 = vmatprep.subr.mxu1 %v1191_v0 }
 0x2b3   :  { %1090 = vmatpush3.msra.mxu1 %v1341_v18 }
 0x2b4   :  { %1091 = vmatprep.subr.mxu1 %v1191_v0 }
 0x2b5   :  { %1092 = vmatpush3.msra.mxu1 %v1350_v19 }
 0x2b6   :  { %1093 = vmatprep.subr.mxu1 %v1191_v0 }
 0x2b7   :  { %1094 = vmatpush3.msra.mxu1 %v1359_v20 }
 0x2b8   :  { %1095 = vmatprep.subr.mxu1 %v1191_v0 }
 0x2b9   :  { %1096 = vmatpush3.msra.mxu1 %v1368_v21 }
 0x2ba   :  { %1135 = vmatprep.subr.mxu1 %v1191_v0 }
 0x35a   :  { %v384_v52 = vpop.f32.mrf.mxu1 }
 0x35b   :  { %v388_v53 = vadd.f32 %v384_v52, %v316_v51 }
 0x35c   :  { %v1029_v54 = vpop.f32.mrf.mxu1 }
 0x35d   :  { %v389_v55 = vadd.f32 %v1434_v26, %v388_v53 }
 0x35f   :  { %1181 = vtanh.f32 %v389_v55 }
 0x36c   :  { %v1182_v56 = vpop.eup %1181 }
 0x36d   :  { %745 = vst [vmem:[%s1660_s5 + $0x18] sm:$0xff] %v1182_v56  ;;  %1063 = vmatmul.mubr.f32.vlgmr.msra.gmra.mxu0 %v1182_v56 }
 0x36e   :  { %1101 = vmatpush3.msra.mxu0 %v1228_v1  ;;  %1132 = vmatprep.mubr.msk.f32.mxu0 %vm1192_vm0, %v1191_v0 }
 0x36f   :  { %1102 = vmatprep.subr.mxu0 %v1191_v0 }
 0x370   :  { %1103 = vmatpush3.msra.mxu0 %v1233_v2 }
 0x371   :  { %1104 = vmatprep.subr.mxu0 %v1191_v0 }
 0x372   :  { %1105 = vmatpush3.msra.mxu0 %v1243_v4 }
 0x373   :  { %1106 = vmatprep.subr.mxu0 %v1191_v0 }
 0x374   :  { %1107 = vmatpush3.msra.mxu0 %v1252_v5 }
 0x375   :  { %1108 = vmatprep.subr.mxu0 %v1191_v0 }
 0x376   :  { %1109 = vmatpush3.msra.mxu0 %v1264_v7 }
 0x377   :  { %1110 = vmatprep.subr.mxu0 %v1191_v0 }
 0x378   :  { %1111 = vmatpush3.msra.mxu0 %v1275_v9 }
 0x379   :  { %1112 = vmatprep.subr.mxu0 %v1191_v0 }
 0x37a   :  { %1113 = vmatpush3.msra.mxu0 %v1284_v10 }
 0x37b   :  { %1114 = vmatprep.subr.mxu0 %v1191_v0 }
 0x37c   :  { %1115 = vmatpush3.msra.mxu0 %v1295_v12 }
 0x37d   :  { %1116 = vmatprep.subr.mxu0 %v1191_v0 }
 0x37e   :  { %1117 = vmatpush3.msra.mxu0 %v1304_v13 }
 0x37f   :  { %1118 = vmatprep.subr.mxu0 %v1191_v0 }
 0x380   :  { %1119 = vmatpush3.msra.mxu0 %v1315_v15 }
 0x381   :  { %1120 = vmatprep.subr.mxu0 %v1191_v0 }
 0x382   :  { %1121 = vmatpush3.msra.mxu0 %v1324_v16 }
 0x383   :  { %1122 = vmatprep.subr.mxu0 %v1191_v0 }
 0x384   :  { %1123 = vmatpush3.msra.mxu0 %v1332_v17 }
 0x385   :  { %1124 = vmatprep.subr.mxu0 %v1191_v0 }
 0x386   :  { %1125 = vmatpush3.msra.mxu0 %v1341_v18 }
 0x387   :  { %1126 = vmatprep.subr.mxu0 %v1191_v0 }
 0x388   :  { %1127 = vmatpush3.msra.mxu0 %v1350_v19 }
 0x389   :  { %1128 = vmatprep.subr.mxu0 %v1191_v0 }
 0x38a   :  { %1129 = vmatpush3.msra.mxu0 %v1359_v20 }
 0x38b   :  { %1130 = vmatprep.subr.mxu0 %v1191_v0 }
 0x38c   :  { %1131 = vmatpush3.msra.mxu0 %v1368_v21 }
 0x42d   :  { %v469_v59 = vpop.f32.mrf.mxu0 }
 0x42e   :  { %v473_v60 = vadd.f32 %v469_v59, %v401_v58 }
 0x42f   :  { %v1064_v61 = vpop.f32.mrf.mxu0 }
 0x430   :  { %v474_v62 = vadd.f32 %v1434_v26, %v473_v60 }
 0x432   :  { %1183 = vtanh.f32 %v474_v62 }
 0x43f   :  { %v1184_v63 = vpop.eup %1183 }
 0x440   :  { %747 = vst [vmem:[%s1660_s5 + $0x20] sm:$0xff] %v1184_v63  ;;  %1098 = vmatmul.mubr.f32.vlgmr.msra.gmra.mxu1 %v1184_v63 }
 0x441   :  { %1136 = vmatpush3.msra.mxu1 %v1228_v1  ;;  %1167 = vmatprep.mubr.msk.f32.mxu1 %vm1192_vm0, %v1191_v0  ;;  %v484_v1 = vpop.permute.xlu1 %483 }
 0x442   :  { %1137 = vmatprep.subr.mxu1 %v1191_v0 }
 0x443   :  { %1138 = vmatpush3.msra.mxu1 %v1233_v2  ;;  %v486_v2 = vmul.f32 %v1428_v23, %v484_v1 }
 0x444   :  { %1139 = vmatprep.subr.mxu1 %v1191_v0 }
 0x445   :  { %1140 = vmatpush3.msra.mxu1 %v1243_v4  ;;  %v654_v14 = vpop.permute.xlu1 %653 }
 0x446   :  { %1141 = vmatprep.subr.mxu1 %v1191_v0 }
 0x447   :  { %1142 = vmatpush3.msra.mxu1 %v1252_v5 }
 0x448   :  { %1143 = vmatprep.subr.mxu1 %v1191_v0 }
 0x449   :  { %1144 = vmatpush3.msra.mxu1 %v1264_v7 }
 0x44a   :  { %1145 = vmatprep.subr.mxu1 %v1191_v0 }
 0x44b   :  { %1146 = vmatpush3.msra.mxu1 %v1275_v9 }
 0x44c   :  { %1147 = vmatprep.subr.mxu1 %v1191_v0 }
 0x44d   :  { %1148 = vmatpush3.msra.mxu1 %v1284_v10 }
 0x44e   :  { %1149 = vmatprep.subr.mxu1 %v1191_v0 }
 0x44f   :  { %1150 = vmatpush3.msra.mxu1 %v1295_v12 }
 0x450   :  { %1151 = vmatprep.subr.mxu1 %v1191_v0 }
 0x451   :  { %1152 = vmatpush3.msra.mxu1 %v1304_v13 }
 0x452   :  { %1153 = vmatprep.subr.mxu1 %v1191_v0 }
 0x453   :  { %1154 = vmatpush3.msra.mxu1 %v1315_v15  ;;  %v656_v15 = vmul.f32 %v1428_v23, %v654_v14 }
 0x454   :  { %1155 = vmatprep.subr.mxu1 %v1191_v0 }
 0x455   :  { %1156 = vmatpush3.msra.mxu1 %v1324_v16 }
 0x456   :  { %1157 = vmatprep.subr.mxu1 %v1191_v0 }
 0x457   :  { %1158 = vmatpush3.msra.mxu1 %v1332_v17 }
 0x458   :  { %1159 = vmatprep.subr.mxu1 %v1191_v0 }
 0x459   :  { %1160 = vmatpush3.msra.mxu1 %v1341_v18 }
 0x45a   :  { %1161 = vmatprep.subr.mxu1 %v1191_v0 }
 0x45b   :  { %1162 = vmatpush3.msra.mxu1 %v1350_v19 }
 0x45c   :  { %1163 = vmatprep.subr.mxu1 %v1191_v0 }
 0x45d   :  { %1164 = vmatpush3.msra.mxu1 %v1359_v20 }
 0x45e   :  { %1165 = vmatprep.subr.mxu1 %v1191_v0  ;;  %v571_v0 = vmul.f32 %v1428_v23, %v569_v8 }
 0x45f   :  { %1166 = vmatpush3.msra.mxu1 %v1368_v21 }
 0x500   :  { %v554_v3 = vpop.f32.mrf.mxu1 }
 0x501   :  { %v558_v4 = vadd.f32 %v554_v3, %v486_v2 }
 0x502   :  { %v1099_v5 = vpop.f32.mrf.mxu1 }
 0x503   :  { %v559_v6 = vadd.f32 %v1434_v26, %v558_v4 }
 0x505   :  { %1185 = vtanh.f32 %v559_v6 }
 0x512   :  { %v1186_v7 = vpop.eup %1185 }
 0x513   :  { %749 = vst [vmem:[%s1660_s5 + $0x28] sm:$0xff] %v1186_v7  ;;  %1133 = vmatmul.mubr.f32.vlgmr.msra.gmra.mxu0 %v1186_v7 }
 0x5d3   :  { %v639_v9 = vpop.f32.mrf.mxu0 }
 0x5d4   :  { %v643_v10 = vadd.f32 %v639_v9, %v571_v0 }
 0x5d5   :  { %v1134_v11 = vpop.f32.mrf.mxu0 }
 0x5d6   :  { %v644_v12 = vadd.f32 %v1434_v26, %v643_v10 }
 0x5d8   :  { %1187 = vtanh.f32 %v644_v12 }
 0x5e5   :  { %v1188_v13 = vpop.eup %1187 }
 0x5e6   :  { %751 = vst [vmem:[%s1660_s5 + $0x30] sm:$0xff] %v1188_v13  ;;  %1168 = vmatmul.mubr.f32.vlgmr.msra.gmra.mxu1 %v1188_v13 }
 0x6a6   :  { %v724_v16 = vpop.f32.mrf.mxu1 }
 0x6a7   :  { %v728_v17 = vadd.f32 %v724_v16, %v656_v15 }
 0x6a8   :  { %v1169_v18 = vpop.f32.mrf.mxu1 }
 0x6a9   :  { %v729_v19 = vadd.f32 %v1434_v26, %v728_v17 }
 0x6ab   :  { %1189 = vtanh.f32 %v729_v19 }
 0x6b8   :  { %v1190_v20 = vpop.eup %1189 }
 0x6b9   :  { %753 = vst [vmem:[%s1660_s5 + $0x38] sm:$0xff] %v1190_v20 }

</bundles_post_ra>
